<compile_context>
chip_gen: v7x
topology: tpu7x:2x2x1
jax: 0.10.0
libtpu: 0.0.40
codegen_flags: <defaults>
</compile_context>

<pallas_src>
import functools

import jax
import jax.numpy as jnp
from jax.experimental import pallas as pl
from jax.experimental.pallas import tpu as pltpu

HIDDEN = 512
LANE = 128
SUBLANE = 16              # bf16 sublane packing (also fine for f32)
K_TILE = 512              # reduction tile for the large-input_size path
K_TILE_THRESHOLD = 4096   # switch to K-tiling of layer 1 at/above this input_size


def _round_up(n, m):
    return ((n + m - 1) // m) * m


def _cdiv(a, b):
    return (a + b - 1) // b


def _vmem_capacity_bytes():
    """Physical VMEM of the current chip; conservative (v7x) fallback."""
    try:
        return int(pltpu.get_tpu_info().vmem_capacity_bytes)
    except Exception:
        return 64 * 1024 * 1024


# --------------------------------------------------------------------------
# Kernels
# --------------------------------------------------------------------------
def mlp_kernel(x_ref, w1_ref, b1_ref, w2_ref, b2_ref, w3_ref, b3_ref, o_ref):
    # x arrives in its HBM dtype; cast to the matmul dtype in-kernel (VPU pack,
    # hidden under the K>=32 MXU work) instead of a separate wrapper-side pass.
    x = x_ref[...].astype(w1_ref.dtype)
    h = jnp.dot(x, w1_ref[...], preferred_element_type=jnp.float32)
    h = jnp.maximum(h + b1_ref[...], 0.0)
    h = jnp.dot(h.astype(w2_ref.dtype), w2_ref[...],
                preferred_element_type=jnp.float32)
    h = jnp.maximum(h + b2_ref[...], 0.0)
    h = jnp.dot(h.astype(w3_ref.dtype), w3_ref[...],
                preferred_element_type=jnp.float32)
    o_ref[...] = (h + b3_ref[...]).astype(o_ref.dtype)


def mlp_kernel_ktiled(x_ref, w1_ref, b1_ref, w2_ref, b2_ref, w3_ref, b3_ref,
                      o_ref, acc_ref):
    # Layer 1 K-tiled over grid axis 1 ("arbitrary"); layers 2-3 + store on last k.
    k = pl.program_id(1)

    @pl.when(k == 0)
    def _():
        acc_ref[...] = jnp.zeros_like(acc_ref)

    acc_ref[...] += jnp.dot(x_ref[...].astype(w1_ref.dtype), w1_ref[...],
                            preferred_element_type=jnp.float32)

    @pl.when(k == pl.num_programs(1) - 1)
    def _():
        h = jnp.maximum(acc_ref[...] + b1_ref[...], 0.0)
        h = jnp.dot(h.astype(w2_ref.dtype), w2_ref[...],
                    preferred_element_type=jnp.float32)
        h = jnp.maximum(h + b2_ref[...], 0.0)
        h = jnp.dot(h.astype(w3_ref.dtype), w3_ref[...],
                    preferred_element_type=jnp.float32)
        o_ref[...] = (h + b3_ref[...]).astype(o_ref.dtype)


# --------------------------------------------------------------------------
# Parameter preparation (one-time, outside the per-call path)
# --------------------------------------------------------------------------
def prepare_params(params, compute_dtype=jnp.bfloat16):
    """One-time conversion of Linear params to the kernel layout.

    Weights -> [in_features, out_features] in the MXU compute dtype, feature
    dim padded to a multiple of 128 (lane-dense stores); for the K-tiled path
    (large input_size) w1's reduction dim is padded to a K_TILE multiple.
    """
    w1, b1, w2, b2, w3, b3 = params
    in_dim = w1.shape[0]
    feat_dim = w3.shape[1]
    feat_p = _round_up(feat_dim, LANE)

    if in_dim >= K_TILE_THRESHOLD:
        in_p = _round_up(in_dim, K_TILE)
        w1 = jnp.pad(w1, ((0, in_p - in_dim), (0, 0)))

    w1c = w1.astype(compute_dtype)
    w2c = w2.astype(compute_dtype)
    w3c = jnp.pad(w3, ((0, 0), (0, feat_p - feat_dim))).astype(compute_dtype)

    b1c = b1.reshape(1, HIDDEN).astype(jnp.float32)
    b2c = b2.reshape(1, HIDDEN).astype(jnp.float32)
    b3c = jnp.pad(b3.reshape(1, feat_dim).astype(jnp.float32),
                  ((0, 0), (0, feat_p - feat_dim)))
    return (w1c, b1c, w2c, b2c, w3c, b3c)


# --------------------------------------------------------------------------
# Forward
# --------------------------------------------------------------------------
@functools.partial(jax.jit, static_argnames=("feature_dim", "tile_b"))
def mlp_forward(x, prepared_params, feature_dim, tile_b=None):
    """Fused 3-layer MLP forward. Returns {'features': [B, feature_dim]}."""
    w1, b1, w2, b2, w3, b3 = prepared_params
    B, in_dim = x.shape
    in_p = w1.shape[0]              # == in_dim, or K_TILE-padded for large inputs
    feat_p = w3.shape[1]            # 128-multiple
    out_dtype = x.dtype
    cd_bytes = jnp.dtype(w1.dtype).itemsize
    x_bytes = jnp.dtype(x.dtype).itemsize
    out_bytes = jnp.dtype(out_dtype).itemsize

    use_ktiling = in_p >= K_TILE_THRESHOLD

    # ---- VMEM-driven tile plan ----------------------------------------
    vmem_cap = _vmem_capacity_bytes()
    bias_bytes = 4 * (2 * HIDDEN + feat_p)
    temps_per_row = 4 * (2 * HIDDEN + feat_p)          # f32 h1/h2/h3 live values
    if use_ktiling:
        resident = (cd_bytes * (HIDDEN * HIDDEN + HIDDEN * feat_p) + bias_bytes
                    + 2 * cd_bytes * K_TILE * HIDDEN)  # double-buffered w1 K-blocks
        per_row = (2 * x_bytes * K_TILE + 2 * out_bytes * feat_p
                   + 4 * HIDDEN + temps_per_row)       # + f32 accumulator scratch
    else:
        resident = (cd_bytes * (in_p * HIDDEN + HIDDEN * HIDDEN + HIDDEN * feat_p)
                    + bias_bytes)                      # single-buffered weights
        per_row = 2 * x_bytes * in_p + 2 * out_bytes * feat_p + temps_per_row

    budget = int(vmem_cap * 0.75) - resident
    cap_rows = budget // per_row if budget > per_row else SUBLANE
    cap_rows = max(SUBLANE, min(int(cap_rows), 2048))
    cap_rows = (cap_rows // SUBLANE) * SUBLANE

    if tile_b is None:
        n_tiles = max(1, _cdiv(B, cap_rows))
        # Keep >= 2 batch tiles for mid/large batches so the "parallel" axis
        # can split across both TensorCores on v7x (costs one grid step elsewhere).
        if n_tiles == 1 and B >= 256:
            n_tiles = 2
        tile_b = _round_up(_cdiv(B, n_tiles), SUBLANE)
    else:
        tile_b = max(SUBLANE, _round_up(int(tile_b), SUBLANE))  # validate caller value
        n_tiles = max(1, _cdiv(B, tile_b))
    B_p = n_tiles * tile_b

    vmem_need = resident + tile_b * per_row
    vmem_limit = int(max(min(int(vmem_need * 1.25) + (4 << 20),
                             vmem_cap - (4 << 20)),
                         32 << 20))

    # ---- Pad x only when required (batch remainder / K_TILE padding) ---
    if B_p != B or in_p != in_dim:
        x = jnp.pad(x, ((0, B_p - B), (0, in_p - in_dim)))

    # ---- Advisory cost estimate ----------------------------------------
    flops = 2 * B_p * (in_p * HIDDEN + HIDDEN * HIDDEN + HIDDEN * feat_p)
    bytes_accessed = (B_p * in_p * x_bytes
                      + cd_bytes * (in_p * HIDDEN + HIDDEN * HIDDEN + HIDDEN * feat_p)
                      + bias_bytes
                      + B_p * feat_p * out_bytes)
    cost = pl.CostEstimate(flops=flops, transcendentals=0,
                           bytes_accessed=bytes_accessed)

    # ---- Grid / specs ---------------------------------------------------
    if not use_ktiling:
        grid = (n_tiles,)
        in_specs = [
            pl.BlockSpec((tile_b, in_p), lambda i: (i, 0)),                 # x tile
            pl.BlockSpec((in_p, HIDDEN), lambda i: (0, 0),
                         pipeline_mode=pl.Buffered(1)),                     # w1
            pl.BlockSpec((1, HIDDEN), lambda i: (0, 0),
                         pipeline_mode=pl.Buffered(1)),                     # b1
            pl.BlockSpec((HIDDEN, HIDDEN), lambda i: (0, 0),
                         pipeline_mode=pl.Buffered(1)),                     # w2
            pl.BlockSpec((1, HIDDEN), lambda i: (0, 0),
                         pipeline_mode=pl.Buffered(1)),                     # b2
            pl.BlockSpec((HIDDEN, feat_p), lambda i: (0, 0),
                         pipeline_mode=pl.Buffered(1)),                     # w3
            pl.BlockSpec((1, feat_p), lambda i: (0, 0),
                         pipeline_mode=pl.Buffered(1)),                     # b3
        ]
        out_specs = pl.BlockSpec((tile_b, feat_p), lambda i: (i, 0))
        scratch_shapes = []
        kernel = mlp_kernel
        dims = ("parallel",)
    else:
        n_k = in_p // K_TILE
        grid = (n_tiles, n_k)
        in_specs = [
            pl.BlockSpec((tile_b, K_TILE), lambda i, k: (i, k)),            # x K-block
            pl.BlockSpec((K_TILE, HIDDEN), lambda i, k: (k, 0)),            # w1 K-block
            pl.BlockSpec((1, HIDDEN), lambda i, k: (0, 0),
                         pipeline_mode=pl.Buffered(1)),                     # b1
            pl.BlockSpec((HIDDEN, HIDDEN), lambda i, k: (0, 0),
                         pipeline_mode=pl.Buffered(1)),                     # w2
            pl.BlockSpec((1, HIDDEN), lambda i, k: (0, 0),
                         pipeline_mode=pl.Buffered(1)),                     # b2
            pl.BlockSpec((HIDDEN, feat_p), lambda i, k: (0, 0),
                         pipeline_mode=pl.Buffered(1)),                     # w3
            pl.BlockSpec((1, feat_p), lambda i, k: (0, 0),
                         pipeline_mode=pl.Buffered(1)),                     # b3
        ]
        out_specs = pl.BlockSpec((tile_b, feat_p), lambda i, k: (i, 0))
        scratch_shapes = [pltpu.VMEM((tile_b, HIDDEN), jnp.float32)]
        kernel = mlp_kernel_ktiled
        dims = ("parallel", "arbitrary")

    out = pl.pallas_call(
        kernel,
        out_shape=jax.ShapeDtypeStruct((B_p, feat_p), out_dtype),
        grid_spec=pltpu.PrefetchScalarGridSpec(
            num_scalar_prefetch=0,
            grid=grid,
            in_specs=in_specs,
            out_specs=out_specs,
            scratch_shapes=scratch_shapes,
        ),
        compiler_params=pltpu.CompilerParams(
            dimension_semantics=dims,
            vmem_limit_bytes=vmem_limit),
        cost_estimate=cost,
    )(x, w1, b1, w2, b2, w3, b3)

    # Slice off batch/feature padding.
    return {"features": out[:B, :feature_dim]}


# --------------------------------------------------------------------------
# Init / reference
# --------------------------------------------------------------------------
def init_params(key, input_size, feature_dim, dtype=jnp.float32):
    """Deterministic init (uniform, fan-in scaled, like torch.nn.Linear)."""
    keys = jax.random.split(key, 6)

    def lin(kw, kb, fan_in, fan_out):
        bound = 1.0 / jnp.sqrt(fan_in)
        w = jax.random.uniform(kw, (fan_in, fan_out), dtype, -bound, bound)
        b = jax.random.uniform(kb, (1, fan_out), dtype, -bound, bound)
        return w, b

    w1, b1 = lin(keys[0], keys[1], input_size, HIDDEN)
    w2, b2 = lin(keys[2], keys[3], HIDDEN, HIDDEN)
    w3, b3 = lin(keys[4], keys[5], HIDDEN, feature_dim)
    return (w1, b1, w2, b2, w3, b3)


def mlp_reference(x, params):
    w1, b1, w2, b2, w3, b3 = params
    h = jnp.maximum(x @ w1 + b1, 0.0)
    h = jnp.maximum(h @ w2 + b2, 0.0)
    return h @ w3 + b3


if __name__ == "__main__":
    key = jax.random.PRNGKey(0)
    k_x, k_p = jax.random.split(key)

    batch = 8
    input_size = 32
    feature_dim = 32

    x = jax.random.normal(k_x, (batch, input_size), jnp.float32)
    params = init_params(k_p, input_size, feature_dim)
    prepared = prepare_params(params)   # one-time cast/pad into the kernel layout

    out = mlp_forward(x, prepared, feature_dim=feature_dim)
    feats = jax.block_until_ready(out["features"])

    ref = mlp_reference(x, params)
    assert feats.shape == (batch, feature_dim)
    assert feats.dtype == x.dtype
    # bf16 matmul operands with f32 accumulation -> loosened tolerance
    # (error grows with input_size; fine for inference).
    assert jnp.allclose(feats, ref, atol=5e-2, rtol=5e-2), float(
        jnp.max(jnp.abs(feats - ref)))

    print("KERNEL_OK")
</pallas_src>

<mosaic_0001>
module attributes {stable_mosaic.version = 11 : i64} {
  func.func @mlp_kernel(%arg0: i32, %arg1: memref<16x32xf32, #tpu.memory_space<vmem>>, %arg2: memref<32x512xbf16, #tpu.memory_space<vmem>>, %arg3: memref<1x512xf32, #tpu.memory_space<vmem>>, %arg4: memref<512x512xbf16, #tpu.memory_space<vmem>>, %arg5: memref<1x512xf32, #tpu.memory_space<vmem>>, %arg6: memref<512x128xbf16, #tpu.memory_space<vmem>>, %arg7: memref<1x128xf32, #tpu.memory_space<vmem>>, %arg8: memref<16x128xf32, #tpu.memory_space<vmem>>) attributes {dimension_semantics = [#tpu.dimension_semantics<parallel>], iteration_bounds = array<i64: 1>, scalar_prefetch = 0 : i64, scratch_operands = 0 : i64, tpu.core_type = #tpu.core_type<tc>, window_params = [{transform_indices = @transform_0, window_bounds = array<i64: 16, 32>}, {pipeline_mode = #tpu.pipeline_mode<synchronous>, transform_indices = @transform_1, window_bounds = array<i64: 32, 512>}, {pipeline_mode = #tpu.pipeline_mode<synchronous>, transform_indices = @transform_2, window_bounds = array<i64: 1, 512>}, {pipeline_mode = #tpu.pipeline_mode<synchronous>, transform_indices = @transform_3, window_bounds = array<i64: 512, 512>}, {pipeline_mode = #tpu.pipeline_mode<synchronous>, transform_indices = @transform_4, window_bounds = array<i64: 1, 512>}, {pipeline_mode = #tpu.pipeline_mode<synchronous>, transform_indices = @transform_5, window_bounds = array<i64: 512, 128>}, {pipeline_mode = #tpu.pipeline_mode<synchronous>, transform_indices = @transform_6, window_bounds = array<i64: 1, 128>}, {transform_indices = @transform_7, window_bounds = array<i64: 16, 128>}]} {
    %c0 = arith.constant 0 : index
    %c0_0 = arith.constant 0 : index
    %0 = vector.load %arg1[%c0, %c0_0] : memref<16x32xf32, #tpu.memory_space<vmem>>, vector<16x32xf32>
    %1 = arith.truncf %0 : vector<16x32xf32> to vector<16x32xbf16>
    %c0_1 = arith.constant 0 : index
    %c0_2 = arith.constant 0 : index
    %2 = vector.load %arg2[%c0_1, %c0_2] : memref<32x512xbf16, #tpu.memory_space<vmem>>, vector<32x512xbf16>
    %cst = arith.constant dense<0.000000e+00> : vector<16x512xf32>
    %3 = tpu.matmul %1, %2, %cst {dimension_numbers = #tpu.dot_dimension_numbers<[1], [0], [0], [1], [0, 0, 1, 1], [], []>} : vector<16x32xbf16>, vector<32x512xbf16>, vector<16x512xf32> -> vector<16x512xf32>
    %c0_3 = arith.constant 0 : index
    %c0_4 = arith.constant 0 : index
    %4 = vector.load %arg3[%c0_3, %c0_4] : memref<1x512xf32, #tpu.memory_space<vmem>>, vector<1x512xf32>
    %5 = vector.broadcast %4 : vector<1x512xf32> to vector<16x512xf32>
    %6 = arith.addf %3, %5 : vector<16x512xf32>
    %cst_5 = arith.constant 0.000000e+00 : f32
    %7 = vector.broadcast %cst_5 : f32 to vector<16x512xf32>
    %8 = arith.maximumf %6, %7 : vector<16x512xf32>
    %9 = arith.truncf %8 : vector<16x512xf32> to vector<16x512xbf16>
    %c0_6 = arith.constant 0 : index
    %c0_7 = arith.constant 0 : index
    %10 = vector.load %arg4[%c0_6, %c0_7] : memref<512x512xbf16, #tpu.memory_space<vmem>>, vector<512x512xbf16>
    %cst_8 = arith.constant dense<0.000000e+00> : vector<16x512xf32>
    %11 = tpu.matmul %9, %10, %cst_8 {dimension_numbers = #tpu.dot_dimension_numbers<[1], [0], [0], [1], [0, 0, 1, 1], [], []>} : vector<16x512xbf16>, vector<512x512xbf16>, vector<16x512xf32> -> vector<16x512xf32>
    %c0_9 = arith.constant 0 : index
    %c0_10 = arith.constant 0 : index
    %12 = vector.load %arg5[%c0_9, %c0_10] : memref<1x512xf32, #tpu.memory_space<vmem>>, vector<1x512xf32>
    %13 = vector.broadcast %12 : vector<1x512xf32> to vector<16x512xf32>
    %14 = arith.addf %11, %13 : vector<16x512xf32>
    %cst_11 = arith.constant 0.000000e+00 : f32
    %15 = vector.broadcast %cst_11 : f32 to vector<16x512xf32>
    %16 = arith.maximumf %14, %15 : vector<16x512xf32>
    %17 = arith.truncf %16 : vector<16x512xf32> to vector<16x512xbf16>
    %c0_12 = arith.constant 0 : index
    %c0_13 = arith.constant 0 : index
    %18 = vector.load %arg6[%c0_12, %c0_13] : memref<512x128xbf16, #tpu.memory_space<vmem>>, vector<512x128xbf16>
    %cst_14 = arith.constant dense<0.000000e+00> : vector<16x128xf32>
    %19 = tpu.matmul %17, %18, %cst_14 {dimension_numbers = #tpu.dot_dimension_numbers<[1], [0], [0], [1], [0, 0, 1, 1], [], []>} : vector<16x512xbf16>, vector<512x128xbf16>, vector<16x128xf32> -> vector<16x128xf32>
    %c0_15 = arith.constant 0 : index
    %c0_16 = arith.constant 0 : index
    %20 = vector.load %arg7[%c0_15, %c0_16] : memref<1x128xf32, #tpu.memory_space<vmem>>, vector<1x128xf32>
    %21 = vector.broadcast %20 : vector<1x128xf32> to vector<16x128xf32>
    %22 = arith.addf %19, %21 : vector<16x128xf32>
    %c0_17 = arith.constant 0 : index
    %c0_18 = arith.constant 0 : index
    %23 = vector.load %arg8[%c0_17, %c0_18] : memref<16x128xf32, #tpu.memory_space<vmem>>, vector<16x128xf32>
    tpu.vector_store %arg8[%c0_17, %c0_18], %22 {strides = array<i32>} : memref<16x128xf32, #tpu.memory_space<vmem>>, vector<16x128xf32>,
    return
  }
  func.func @transform_0(%arg0: i32) -> (i32, i32) {
    %c0_i32 = arith.constant 0 : i32
    %c0_i32_0 = arith.constant 0 : i32
    return %arg0, %c0_i32 : i32, i32
  }
  func.func @transform_1(%arg0: i32) -> (i32, i32) {
    %c0_i32 = arith.constant 0 : i32
    %c0_i32_0 = arith.constant 0 : i32
    %c0_i32_1 = arith.constant 0 : i32
    return %c0_i32, %c0_i32_0 : i32, i32
  }
  func.func @transform_2(%arg0: i32) -> (i32, i32) {
    %c0_i32 = arith.constant 0 : i32
    %c0_i32_0 = arith.constant 0 : i32
    %c0_i32_1 = arith.constant 0 : i32
    return %c0_i32, %c0_i32_0 : i32, i32
  }
  func.func @transform_3(%arg0: i32) -> (i32, i32) {
    %c0_i32 = arith.constant 0 : i32
    %c0_i32_0 = arith.constant 0 : i32
    %c0_i32_1 = arith.constant 0 : i32
    return %c0_i32, %c0_i32_0 : i32, i32
  }
  func.func @transform_4(%arg0: i32) -> (i32, i32) {
    %c0_i32 = arith.constant 0 : i32
    %c0_i32_0 = arith.constant 0 : i32
    %c0_i32_1 = arith.constant 0 : i32
    return %c0_i32, %c0_i32_0 : i32, i32
  }
  func.func @transform_5(%arg0: i32) -> (i32, i32) {
    %c0_i32 = arith.constant 0 : i32
    %c0_i32_0 = arith.constant 0 : i32
    %c0_i32_1 = arith.constant 0 : i32
    return %c0_i32, %c0_i32_0 : i32, i32
  }
  func.func @transform_6(%arg0: i32) -> (i32, i32) {
    %c0_i32 = arith.constant 0 : i32
    %c0_i32_0 = arith.constant 0 : i32
    %c0_i32_1 = arith.constant 0 : i32
    return %c0_i32, %c0_i32_0 : i32, i32
  }
  func.func @transform_7(%arg0: i32) -> (i32, i32) {
    %c0_i32 = arith.constant 0 : i32
    %c0_i32_0 = arith.constant 0 : i32
    return %arg0, %c0_i32 : i32, i32
  }
}

</mosaic_0001>

<bundles_post_ra>
// kernel: mlp_forward.1
= control target key start
LH: loop header
LB: loop body
LE: loop exit
PB: predicated region body
PF: predicated region fallthrough
CT: control target
= control target key end

     0   :  { %12 = vsyncpa [#allocation3], 0  ;;  %s2255_s0 = inlined_call_operand.vmem [shape: f32[16,32], index: 0, kind: input, shape index: {}]   ;;  %s2256_s1 = inlined_call_operand.hbm [shape: bf16[32,512], index: 1, kind: input, shape index: {}]   ;;  %s2257_s2 = inlined_call_operand.vmem [shape: f32[1,512], index: 2, kind: input, shape index: {}]   ;;  %s2258_s3 = inlined_call_operand.hbm [shape: bf16[512,512], index: 3, kind: input, shape index: {}]   ;;  %s2259_s4 = inlined_call_operand.vmem [shape: f32[1,512], index: 4, kind: input, shape index: {}]   ;;  %s2260_s5 = inlined_call_operand.hbm [shape: bf16[512,128], index: 5, kind: input, shape index: {}]   ;;  %s2261_s6 = inlined_call_operand.vmem [shape: f32[1,128], index: 6, kind: input, shape index: {}]   ;;  %s2262_s7 = inlined_call_operand.vmem [shape: f32[16,128], index: 7, kind: output, shape index: {}]  }
   0x1   :  { %13 = vsyncpa [#allocation5], 0  ;;  %s2115_s24 = smov [#allocation4]   ;;  %s2116_s26 = smov [#allocation2]  }
   0x2   :  { %s35_s25 = sshll.u32 %s2115_s24, 4  ;;  %s21_s27 = sshll.u32 %s2116_s26, 4  ;;  %s36_s25 = int_to_ptr.vmem [resolvable:$true] %s35_s25  ;;  %s2163_s27 = int_to_ptr.vmem [resolvable:$true] %s21_s27 }
   0x3   :  { %s2045_s30 = scalar_lea.hbm %s2258_s3, 16384 }
   0x4   :  { %p2046_p0 = scmp.ne.s32.totalorder %s2258_s3, %s2045_s30  ;;  %p2049_p1 = scmp.lt.u32.totalorder %s2045_s30, %s2258_s3 }
   0x6   :  { %p2051_p2 = pnand %p2049_p1, %p2046_p0 }
   0x8   :  { %2054 = shalt.err (!%p2051_p2)
}
   0x9   :  { %s2055_s12 = scalar_lea.vmem %s36_s25, 16384  ;;  %p2060_p4 = scmp.lt.s32.totalorder %s36_s25, %s36_s25 }
   0xa   :  { %p2056_p3 = scmp.ne.s32.totalorder %s36_s25, %s2055_s12  ;;  %p2061_p5 = scmp.lt.s32.totalorder %s2055_s12, %s2055_s12 }
   0xc   :  { %p2062_p6 = por %p2061_p5, %p2060_p4 }
   0xe   :  { %p2063_p7 = pnand %p2062_p6, %p2056_p3 }
  0x10   :  { %2066 = shalt.err (!%p2063_p7)
}
  0x11   :  { %s2117_s13 = smov 256   ;;  %s2118_s14 = smov 16  }
  0x12   :  { %41 = dma.hbm_to_vmem [thread:$0]  %s2258_s3, 16384, %s36_s25, [#allocation5], %s2117_s13, %s2117_s13, %s2118_s14  }
  0x13   :  { %s2067_s19 = scalar_lea.hbm %s2256_s1, 1024 }
  0x14   :  { %p2068_p8 = scmp.ne.s32.totalorder %s2256_s1, %s2067_s19  ;;  %p2071_p9 = scmp.lt.u32.totalorder %s2067_s19, %s2256_s1 }
  0x16   :  { %p2073_p10 = pnand %p2071_p9, %p2068_p8 }
  0x18   :  { %2076 = shalt.err (!%p2073_p10)
}
  0x19   :  { %s2077_s24 = scalar_lea.vmem %s2163_s27, 1024  ;;  %p2082_p12 = scmp.lt.s32.totalorder %s2163_s27, %s2163_s27 }
  0x1a   :  { %p2078_p11 = scmp.ne.s32.totalorder %s2163_s27, %s2077_s24  ;;  %p2083_p13 = scmp.lt.s32.totalorder %s2077_s24, %s2077_s24 }
  0x1c   :  { %p2084_p0 = por %p2083_p13, %p2082_p12 }
  0x1e   :  { %p2085_p1 = pnand %p2084_p0, %p2078_p11 }
  0x20   :  { %2088 = shalt.err (!%p2085_p1)
}
  0x21   :  { %27 = dma.hbm_to_vmem [thread:$0]  %s2256_s1, 1024, %s2163_s27, [#allocation3], %s2117_s13, %s2117_s13, %s2118_s14  }
  0x22   :  { %s2119_s26 = smov [#allocation6]   ;;  %s2089_s8 = scalar_lea.hbm %s2260_s5, 4096 }
  0x23   :  { %s49_s28 = sshll.u32 %s2119_s26, 4  ;;  %p2090_p2 = scmp.ne.s32.totalorder %s2260_s5, %s2089_s8  ;;  %s50_s28 = int_to_ptr.vmem [resolvable:$true] %s49_s28 }
  0x24   :  { %p2093_p3 = scmp.lt.u32.totalorder %s2089_s8, %s2260_s5 }
  0x26   :  { %p2095_p4 = pnand %p2093_p3, %p2090_p2 }
  0x28   :  { %2098 = shalt.err (!%p2095_p4)
}
  0x29   :  { %s2099_s15 = scalar_lea.vmem %s50_s28, 4096  ;;  %p2104_p6 = scmp.lt.s32.totalorder %s50_s28, %s50_s28 }
  0x2a   :  { %p2100_p5 = scmp.ne.s32.totalorder %s50_s28, %s2099_s15  ;;  %p2105_p7 = scmp.lt.s32.totalorder %s2099_s15, %s2099_s15 }
  0x2c   :  { %p2106_p8 = por %p2105_p7, %p2104_p6 }
  0x2e   :  { %p2107_p9 = pnand %p2106_p8, %p2100_p5 }
  0x30   :  { %2110 = shalt.err (!%p2107_p9)
}
  0x31   :  { %s2120_s1 = smov 64   ;;  %s2121_s27 = smov 4  }
  0x32   :  { %55 = dma.hbm_to_vmem [thread:$0]  %s2260_s5, 4096, %s50_s28, [#allocation5], %s2120_s1, %s2120_s1, %s2121_s27  }
  0x33   :  { %2111 = dma.done.wait [#allocation3], 1024  }
  0x34   :  { %2112 = vsyncadd [#allocation3], 4294966272 }
  0x35   :  { %2113 = dma.done.wait [#allocation5], 20480  }
  0x36   :  { %2114 = vsyncadd [#allocation5], 4294946816  ;;  %v2122_v0 = vmov 0   ;;  %v1809_v1 = vld [vmem:[#allocation2 + $0x4] ss:$16 sps:$4 sm:$0xff]   ;;  %v69_v6 = vld [vmem:[%s2255_s0 + $0x8] sm:$0xff] }
  0x37   :  { %177 = vmatprep.mubr.bf16.mxu0 %v2122_v0  ;;  %220 = vmatprep.mubr.bf16.mxu1 %v2122_v0  ;;  %v1811_v2 = vld [vmem:[#allocation2] ss:$16 sps:$4 sm:$0xff]   ;;  %v1812_v3 = vld [vmem:[#allocation2 + $0x24] ss:$16 sps:$4 sm:$0xff]   ;;  %v1815_v7 = vld [vmem:[#allocation2 + $0xc] ss:$16 sps:$4 sm:$0xff]  }
  0x38   :  { %145 = vmatprep.subr.bf16.mxu0 %v1809_v1  ;;  %v1814_v4 = vld [vmem:[#allocation2 + $0x20] ss:$16 sps:$4 sm:$0xff]   ;;  %v1817_v8 = vld [vmem:[#allocation2 + $0x8] ss:$16 sps:$4 sm:$0xff]   ;;  %v1818_v9 = vld [vmem:[#allocation2 + $0x2c] ss:$16 sps:$4 sm:$0xff]   ;;  %188 = vmatprep.subr.bf16.mxu1 %v1815_v7 }
  0x39   :  { %v68_v5 = vld [vmem:[%s2255_s0] sm:$0xff]  ;;  %146 = vmatpush1.bf16.msra.mxu0 %v1811_v2  ;;  %v1820_v10 = vld [vmem:[#allocation2 + $0x28] ss:$16 sps:$4 sm:$0xff]   ;;  %vm141_vm0 = vcmask 261120   ;;  %189 = vmatpush1.bf16.msra.mxu1 %v1817_v8  ;;  %v1826_v14 = vld [vmem:[#allocation4 + $0xc] ss:$16 sps:$4 sm:$0xff]  }
  0x3a   :  { %147 = vmatprep.subr.bf16.mxu0 %v1812_v3  ;;  %v70_v11 = vpack.c.bf16 %v69_v6, %v68_v5  ;;  %v1821_v12 = vld [vmem:[#allocation4] ss:$16 sps:$4 sm:$0xff]   ;;  %v1823_v13 = vld [vmem:[#allocation4 + $0x4] ss:$16 sps:$4 sm:$0xff]   ;;  %190 = vmatprep.subr.bf16.mxu1 %v1818_v9  ;;  %v1824_v16 = vld [vmem:[#allocation4 + $0x8] ss:$16 sps:$4 sm:$0xff]  }
  0x3b   :  { %v1829_v15 = vld [vmem:[#allocation4 + $0x24] ss:$16 sps:$4 sm:$0xff]   ;;  %v1827_v17 = vld [vmem:[#allocation4 + $0x20] ss:$16 sps:$4 sm:$0xff]   ;;  %v1832_v18 = vld [vmem:[#allocation4 + $0x2c] ss:$16 sps:$4 sm:$0xff]  }
  0x3c   :  { %v1835_v19 = vld [vmem:[#allocation4 + $0x44] ss:$16 sps:$4 sm:$0xff]   ;;  %v1830_v20 = vld [vmem:[#allocation4 + $0x28] ss:$16 sps:$4 sm:$0xff]   ;;  %v1833_v21 = vld [vmem:[#allocation4 + $0x40] ss:$16 sps:$4 sm:$0xff]  }
  0x3d   :  { %148 = vmatpush1.bf16.msra.mxu0 %v1814_v4  ;;  %191 = vmatpush1.bf16.msra.mxu1 %v1820_v10  ;;  %v1838_v22 = vld [vmem:[#allocation4 + $0x4c] ss:$16 sps:$4 sm:$0xff]   ;;  %v1841_v23 = vld [vmem:[#allocation4 + $0x64] ss:$16 sps:$4 sm:$0xff]   ;;  %v1836_v24 = vld [vmem:[#allocation4 + $0x48] ss:$16 sps:$4 sm:$0xff]  }
  0x3e   :  { %1033 = vmatprep.subr.bf16.mxu0 %v1823_v13  ;;  %1119 = vmatprep.subr.bf16.mxu1 %v1826_v14  ;;  %v1839_v25 = vld [vmem:[#allocation4 + $0x60] ss:$16 sps:$4 sm:$0xff]   ;;  %v1844_v26 = vld [vmem:[#allocation4 + $0x6c] ss:$16 sps:$4 sm:$0xff]   ;;  %v1847_v27 = vld [vmem:[#allocation4 + $0x84] ss:$16 sps:$4 sm:$0xff]   ;;  %v81_v14 = vlaneseq }
  0x3f   :  { %v1842_v28 = vld [vmem:[#allocation4 + $0x68] ss:$16 sps:$4 sm:$0xff]   ;;  %v1845_v29 = vld [vmem:[#allocation4 + $0x80] ss:$16 sps:$4 sm:$0xff]   ;;  %v1850_v30 = vld [vmem:[#allocation4 + $0x8c] ss:$16 sps:$4 sm:$0xff]  }
  0x40   :  { %1578 = vmatmul.mubr.msk.bf16.vlgmr.msra.gmra.mrb[0].mxu0 %vm141_vm0, %v70_v11  ;;  %1579 = vmatmul.mubr.msk.bf16.vlgmr.msra.gmra.mrb[0].mxu1 %vm141_vm0, %v70_v11  ;;  %v1853_v31 = vld [vmem:[#allocation4 + $0xa4] ss:$16 sps:$4 sm:$0xff]   ;;  %v1848_v32 = vld [vmem:[#allocation4 + $0x88] ss:$16 sps:$4 sm:$0xff]   ;;  %v1851_v33 = vld [vmem:[#allocation4 + $0xa0] ss:$16 sps:$4 sm:$0xff]  }
  0x41   :  { %1034 = vmatpush1.bf16.msra.mxu0 %v1821_v12  ;;  %1120 = vmatpush1.bf16.msra.mxu1 %v1824_v16  ;;  %v1856_v34 = vld [vmem:[#allocation4 + $0xac] ss:$16 sps:$4 sm:$0xff]   ;;  %v1859_v35 = vld [vmem:[#allocation4 + $0xc4] ss:$16 sps:$4 sm:$0xff]   ;;  %v1854_v36 = vld [vmem:[#allocation4 + $0xa8] ss:$16 sps:$4 sm:$0xff]  }
  0x42   :  { %1035 = vmatprep.subr.bf16.mxu0 %v1829_v15  ;;  %1121 = vmatprep.subr.bf16.mxu1 %v1832_v18  ;;  %v1857_v37 = vld [vmem:[#allocation4 + $0xc0] ss:$16 sps:$4 sm:$0xff]   ;;  %v1862_v38 = vld [vmem:[#allocation4 + $0xcc] ss:$16 sps:$4 sm:$0xff]   ;;  %v1865_v39 = vld [vmem:[#allocation4 + $0xe4] ss:$16 sps:$4 sm:$0xff]  }
  0x43   :  { %v1860_v40 = vld [vmem:[#allocation4 + $0xc8] ss:$16 sps:$4 sm:$0xff]   ;;  %v1863_v41 = vld [vmem:[#allocation4 + $0xe0] ss:$16 sps:$4 sm:$0xff]   ;;  %v1868_v42 = vld [vmem:[#allocation4 + $0xec] ss:$16 sps:$4 sm:$0xff]  }
  0x44   :  { %v1871_v43 = vld [vmem:[#allocation4 + $0x104] ss:$16 sps:$4 sm:$0xff]   ;;  %v1866_v44 = vld [vmem:[#allocation4 + $0xe8] ss:$16 sps:$4 sm:$0xff]   ;;  %v1869_v45 = vld [vmem:[#allocation4 + $0x100] ss:$16 sps:$4 sm:$0xff]  }
  0x45   :  { %1036 = vmatpush1.bf16.msra.mxu0 %v1827_v17  ;;  %1122 = vmatpush1.bf16.msra.mxu1 %v1830_v20  ;;  %v1874_v46 = vld [vmem:[#allocation4 + $0x10c] ss:$16 sps:$4 sm:$0xff]   ;;  %v1877_v47 = vld [vmem:[#allocation4 + $0x124] ss:$16 sps:$4 sm:$0xff]   ;;  %v1872_v48 = vld [vmem:[#allocation4 + $0x108] ss:$16 sps:$4 sm:$0xff]  }
  0x46   :  { %1037 = vmatprep.subr.bf16.mxu0 %v1835_v19  ;;  %1123 = vmatprep.subr.bf16.mxu1 %v1838_v22  ;;  %v1875_v49 = vld [vmem:[#allocation4 + $0x120] ss:$16 sps:$4 sm:$0xff]   ;;  %v1880_v50 = vld [vmem:[#allocation4 + $0x12c] ss:$16 sps:$4 sm:$0xff]   ;;  %v1883_v51 = vld [vmem:[#allocation4 + $0x144] ss:$16 sps:$4 sm:$0xff]  }
  0x47   :  { %v1878_v52 = vld [vmem:[#allocation4 + $0x128] ss:$16 sps:$4 sm:$0xff]   ;;  %v1881_v53 = vld [vmem:[#allocation4 + $0x140] ss:$16 sps:$4 sm:$0xff]   ;;  %v1886_v54 = vld [vmem:[#allocation4 + $0x14c] ss:$16 sps:$4 sm:$0xff]  }
  0x48   :  { %v1889_v55 = vld [vmem:[#allocation4 + $0x164] ss:$16 sps:$4 sm:$0xff]   ;;  %v1884_v56 = vld [vmem:[#allocation4 + $0x148] ss:$16 sps:$4 sm:$0xff]   ;;  %v1887_v57 = vld [vmem:[#allocation4 + $0x160] ss:$16 sps:$4 sm:$0xff]  }
  0x49   :  { %1038 = vmatpush1.bf16.msra.mxu0 %v1833_v21  ;;  %1124 = vmatpush1.bf16.msra.mxu1 %v1836_v24  ;;  %v1892_v58 = vld [vmem:[#allocation4 + $0x16c] ss:$16 sps:$4 sm:$0xff]   ;;  %v1895_v59 = vld [vmem:[#allocation4 + $0x184] ss:$16 sps:$4 sm:$0xff]   ;;  %v1890_v60 = vld [vmem:[#allocation4 + $0x168] ss:$16 sps:$4 sm:$0xff]  }
  0x4a   :  { %1039 = vmatprep.subr.bf16.mxu0 %v1841_v23  ;;  %1125 = vmatprep.subr.bf16.mxu1 %v1844_v26  ;;  %v1893_v61 = vld [vmem:[#allocation4 + $0x180] ss:$16 sps:$4 sm:$0xff]   ;;  %v1898_v62 = vld [vmem:[#allocation4 + $0x18c] ss:$16 sps:$4 sm:$0xff]   ;;  %v1901_v63 = vld [vmem:[#allocation4 + $0x1a4] ss:$16 sps:$4 sm:$0xff]  }
  0x4b   :  { %v1896_v0 = vld [vmem:[#allocation4 + $0x188] ss:$16 sps:$4 sm:$0xff]   ;;  %v1899_v1 = vld [vmem:[#allocation4 + $0x1a0] ss:$16 sps:$4 sm:$0xff]   ;;  %v1904_v2 = vld [vmem:[#allocation4 + $0x1ac] ss:$16 sps:$4 sm:$0xff]  }
  0x4c   :  { %v1902_v3 = vld [vmem:[#allocation4 + $0x1a8] ss:$16 sps:$4 sm:$0xff]   ;;  %v1907_v4 = vld [vmem:[#allocation4 + $0x1c4] ss:$16 sps:$4 sm:$0xff]   ;;  %v1910_v5 = vld [vmem:[#allocation4 + $0x1cc] ss:$16 sps:$4 sm:$0xff]  }
  0x4d   :  { %1040 = vmatpush1.bf16.msra.mxu0 %v1839_v25  ;;  %1126 = vmatpush1.bf16.msra.mxu1 %v1842_v28  ;;  %v1905_v6 = vld [vmem:[#allocation4 + $0x1c0] ss:$16 sps:$4 sm:$0xff]   ;;  %v1908_v7 = vld [vmem:[#allocation4 + $0x1c8] ss:$16 sps:$4 sm:$0xff]   ;;  %v1913_v8 = vld [vmem:[#allocation4 + $0x1e4] ss:$16 sps:$4 sm:$0xff]  }
  0x4e   :  { %1041 = vmatprep.subr.bf16.mxu0 %v1847_v27  ;;  %1127 = vmatprep.subr.bf16.mxu1 %v1850_v30  ;;  %v1916_v9 = vld [vmem:[#allocation4 + $0x1ec] ss:$16 sps:$4 sm:$0xff]   ;;  %v1911_v10 = vld [vmem:[#allocation4 + $0x1e0] ss:$16 sps:$4 sm:$0xff]   ;;  %v1914_v11 = vld [vmem:[#allocation4 + $0x1e8] ss:$16 sps:$4 sm:$0xff]  }
  0x4f   :  { %v1919_v12 = vld [vmem:[#allocation4 + $0x204] ss:$16 sps:$4 sm:$0xff]   ;;  %v1922_v13 = vld [vmem:[#allocation4 + $0x20c] ss:$16 sps:$4 sm:$0xff]   ;;  %v2214_v15 = vshrl.u32 %v81_v14, 7 }
  0x50   :  { %v79_v17 = vld [vmem:[%s2257_s2] sm:$0xf]  ;;  %v1956_v14 = vld [vmem:[#allocation4 + $0x2c8] ss:$16 sps:$4 sm:$0xff]  }
  0x51   :  { %1042 = vmatpush1.bf16.msra.mxu0 %v1845_v29  ;;  %1128 = vmatpush1.bf16.msra.mxu1 %v1848_v32  ;;  %v83_v16 = vsub.s32 0, %v2214_v15  ;;  %v87_v18 = vsub.s32 1, %v2214_v15  ;;  %v91_v20 = vsub.s32 2, %v2214_v15  ;;  %v95_v22 = vsub.s32 3, %v2214_v15 }
  0x52   :  { %1043 = vmatprep.subr.bf16.mxu0 %v1853_v31  ;;  %1129 = vmatprep.subr.bf16.mxu1 %v1856_v34 }
  0x53   :  { %v84_v19 = vrot.slane %v79_v17, %v83_v16  ;;  %v88_v21 = vrot.slane %v79_v17, %v87_v18  ;;  %v92_v26 = vrot.slane %v79_v17, %v91_v20  ;;  %v96_v29 = vrot.slane %v79_v17, %v95_v22  ;;  %v1961_v17 = vld [vmem:[#allocation4 + $0x2e4] ss:$16 sps:$4 sm:$0xff]  }
  0x55   :  { %1044 = vmatpush1.bf16.msra.mxu0 %v1851_v33  ;;  %1130 = vmatpush1.bf16.msra.mxu1 %v1854_v36 }
  0x56   :  { %1045 = vmatprep.subr.bf16.mxu0 %v1859_v35  ;;  %1131 = vmatprep.subr.bf16.mxu1 %v1862_v38 }
  0x59   :  { %1046 = vmatpush1.bf16.msra.mxu0 %v1857_v37  ;;  %1132 = vmatpush1.bf16.msra.mxu1 %v1860_v40 }
  0x5a   :  { %1047 = vmatprep.subr.bf16.mxu0 %v1865_v39  ;;  %1133 = vmatprep.subr.bf16.mxu1 %v1868_v42 }
  0x5d   :  { %1048 = vmatpush1.bf16.msra.mxu0 %v1863_v41  ;;  %1134 = vmatpush1.bf16.msra.mxu1 %v1866_v44 }
  0x5e   :  { %1049 = vmatprep.subr.bf16.mxu0 %v1871_v43  ;;  %1135 = vmatprep.subr.bf16.mxu1 %v1874_v46 }
  0x61   :  { %1050 = vmatpush1.bf16.msra.mxu0 %v1869_v45  ;;  %1136 = vmatpush1.bf16.msra.mxu1 %v1872_v48  ;;  %v1920_v48 = vld [vmem:[#allocation4 + $0x208] ss:$16 sps:$4 sm:$0xff]  }
  0x62   :  { %1051 = vmatprep.subr.bf16.mxu0 %v1877_v47  ;;  %1137 = vmatprep.subr.bf16.mxu1 %v1880_v50  ;;  %v1917_v47 = vld [vmem:[#allocation4 + $0x200] ss:$16 sps:$4 sm:$0xff]  }
  0x65   :  { %1052 = vmatpush1.bf16.msra.mxu0 %v1875_v49  ;;  %1138 = vmatpush1.bf16.msra.mxu1 %v1878_v52  ;;  %v1928_v52 = vld [vmem:[#allocation4 + $0x22c] ss:$16 sps:$4 sm:$0xff]  }
  0x66   :  { %1053 = vmatprep.subr.bf16.mxu0 %v1883_v51  ;;  %1139 = vmatprep.subr.bf16.mxu1 %v1886_v54  ;;  %v1925_v51 = vld [vmem:[#allocation4 + $0x224] ss:$16 sps:$4 sm:$0xff]  }
  0x69   :  { %1054 = vmatpush1.bf16.msra.mxu0 %v1881_v53  ;;  %1140 = vmatpush1.bf16.msra.mxu1 %v1884_v56  ;;  %v1923_v56 = vld [vmem:[#allocation4 + $0x220] ss:$16 sps:$4 sm:$0xff]  }
  0x6a   :  { %1055 = vmatprep.subr.bf16.mxu0 %v1889_v55  ;;  %1141 = vmatprep.subr.bf16.mxu1 %v1892_v58 }
  0x6d   :  { %1056 = vmatpush1.bf16.msra.mxu0 %v1887_v57  ;;  %1142 = vmatpush1.bf16.msra.mxu1 %v1890_v60  ;;  %v1926_v57 = vld [vmem:[#allocation4 + $0x228] ss:$16 sps:$4 sm:$0xff]   ;;  %v1934_v60 = vld [vmem:[#allocation4 + $0x24c] ss:$16 sps:$4 sm:$0xff]  }
  0x6e   :  { %1057 = vmatprep.subr.bf16.mxu0 %v1895_v59  ;;  %1143 = vmatprep.subr.bf16.mxu1 %v1898_v62  ;;  %v1931_v59 = vld [vmem:[#allocation4 + $0x244] ss:$16 sps:$4 sm:$0xff]   ;;  %v1932_v62 = vld [vmem:[#allocation4 + $0x248] ss:$16 sps:$4 sm:$0xff]  }
  0x71   :  { %1058 = vmatpush1.bf16.msra.mxu0 %v1893_v61  ;;  %1144 = vmatpush1.bf16.msra.mxu1 %v1896_v0  ;;  %v1929_v61 = vld [vmem:[#allocation4 + $0x240] ss:$16 sps:$4 sm:$0xff]   ;;  %v1940_v0 = vld [vmem:[#allocation4 + $0x26c] ss:$16 sps:$4 sm:$0xff]  }
  0x72   :  { %1059 = vmatprep.subr.bf16.mxu0 %v1901_v63  ;;  %1145 = vmatprep.subr.bf16.mxu1 %v1904_v2  ;;  %v1937_v63 = vld [vmem:[#allocation4 + $0x264] ss:$16 sps:$4 sm:$0xff]   ;;  %v1938_v2 = vld [vmem:[#allocation4 + $0x268] ss:$16 sps:$4 sm:$0xff]  }
  0x75   :  { %1060 = vmatpush1.bf16.msra.mxu0 %v1899_v1  ;;  %1146 = vmatpush1.bf16.msra.mxu1 %v1902_v3  ;;  %v1935_v1 = vld [vmem:[#allocation4 + $0x260] ss:$16 sps:$4 sm:$0xff]   ;;  %v1943_v3 = vld [vmem:[#allocation4 + $0x284] ss:$16 sps:$4 sm:$0xff]  }
  0x76   :  { %1061 = vmatprep.subr.bf16.mxu0 %v1907_v4  ;;  %1147 = vmatprep.subr.bf16.mxu1 %v1910_v5  ;;  %v1946_v4 = vld [vmem:[#allocation4 + $0x28c] ss:$16 sps:$4 sm:$0xff]   ;;  %v1941_v5 = vld [vmem:[#allocation4 + $0x280] ss:$16 sps:$4 sm:$0xff]  }
  0x79   :  { %1062 = vmatpush1.bf16.msra.mxu0 %v1905_v6  ;;  %1148 = vmatpush1.bf16.msra.mxu1 %v1908_v7  ;;  %v1944_v6 = vld [vmem:[#allocation4 + $0x288] ss:$16 sps:$4 sm:$0xff]   ;;  %v1949_v7 = vld [vmem:[#allocation4 + $0x2a4] ss:$16 sps:$4 sm:$0xff]  }
  0x7a   :  { %1063 = vmatprep.subr.bf16.mxu0 %v1913_v8  ;;  %1149 = vmatprep.subr.bf16.mxu1 %v1916_v9  ;;  %v1952_v8 = vld [vmem:[#allocation4 + $0x2ac] ss:$16 sps:$4 sm:$0xff]   ;;  %v1947_v9 = vld [vmem:[#allocation4 + $0x2a0] ss:$16 sps:$4 sm:$0xff]  }
  0x7d   :  { %1064 = vmatpush1.bf16.msra.mxu0 %v1911_v10  ;;  %1150 = vmatpush1.bf16.msra.mxu1 %v1914_v11  ;;  %v1950_v10 = vld [vmem:[#allocation4 + $0x2a8] ss:$16 sps:$4 sm:$0xff]   ;;  %v1955_v11 = vld [vmem:[#allocation4 + $0x2c4] ss:$16 sps:$4 sm:$0xff]  }
  0x7e   :  { %1076 = vmatprep.subr.bf16.mxu0 %v1919_v12  ;;  %1162 = vmatprep.subr.bf16.mxu1 %v1922_v13  ;;  %v1958_v12 = vld [vmem:[#allocation4 + $0x2cc] ss:$16 sps:$4 sm:$0xff]   ;;  %v1953_v13 = vld [vmem:[#allocation4 + $0x2c0] ss:$16 sps:$4 sm:$0xff]  }
 0x113   :  { %v179_v23 = vpop.f32.mrb[0].mxu0  ;;  %v222_v33 = vpop.f32.mrb[0].mxu1 }
 0x114   :  { %v180_v24 = vadd.f32 %v179_v23, %v84_v19  ;;  %v181_v25 = vpop.f32.mrb[1].mxu0  ;;  %v223_v36 = vadd.f32 %v222_v33, %v92_v26  ;;  %v224_v37 = vpop.f32.mrb[1].mxu1  ;;  %v1962_v23 = vld [vmem:[#allocation4 + $0x2e8] ss:$16 sps:$4 sm:$0xff]   ;;  %v1982_v33 = vld [vmem:[#allocation4 + $0x34c] ss:$16 sps:$4 sm:$0xff]  }
 0x115   :  { %v182_v27 = vadd.f32 %v181_v25, %v88_v21  ;;  %v183_v28 = vpop.f32.mrb[2].mxu0  ;;  %v225_v40 = vadd.f32 %v224_v37, %v96_v29  ;;  %v226_v41 = vpop.f32.mrb[2].mxu1  ;;  %v1970_v25 = vld [vmem:[#allocation4 + $0x30c] ss:$16 sps:$4 sm:$0xff]  }
 0x116   :  { %v184_v30 = vadd.f32 %v183_v28, %v84_v19  ;;  %v185_v31 = vpop.f32.mrb[3].mxu0  ;;  %v231_v34 = vmax.f32 %v180_v24, 0.0  ;;  %v233_v43 = vmax.f32 %v223_v36, 0.0  ;;  %v227_v44 = vadd.f32 %v226_v41, %v92_v26  ;;  %v228_v45 = vpop.f32.mrb[3].mxu1  ;;  %v1964_v19 = vld [vmem:[#allocation4 + $0x2ec] ss:$16 sps:$4 sm:$0xff]  }
 0x117   :  { %v186_v32 = vadd.f32 %v185_v31, %v88_v21  ;;  %v232_v38 = vmax.f32 %v182_v27, 0.0  ;;  %v234_v49 = vmax.f32 %v225_v40, 0.0  ;;  %v229_v50 = vadd.f32 %v228_v45, %v96_v29  ;;  %v1959_v21 = vld [vmem:[#allocation4 + $0x2e0] ss:$16 sps:$4 sm:$0xff]   ;;  %v1967_v24 = vld [vmem:[#allocation4 + $0x304] ss:$16 sps:$4 sm:$0xff]  }
 0x118   :  { %v235_v35 = vmax.f32 %v184_v30, 0.0  ;;  %v237_v53 = vmax.f32 %v227_v44, 0.0  ;;  %v1965_v26 = vld [vmem:[#allocation4 + $0x300] ss:$16 sps:$4 sm:$0xff]   ;;  %v1968_v27 = vld [vmem:[#allocation4 + $0x308] ss:$16 sps:$4 sm:$0xff]  }
 0x119   :  { %v236_v39 = vmax.f32 %v186_v32, 0.0  ;;  %v238_v54 = vmax.f32 %v229_v50, 0.0  ;;  %v1973_v28 = vld [vmem:[#allocation4 + $0x324] ss:$16 sps:$4 sm:$0xff]   ;;  %v1976_v29 = vld [vmem:[#allocation4 + $0x32c] ss:$16 sps:$4 sm:$0xff]  }
 0x11a   :  { %v239_v42 = vpack.c.bf16 %v235_v35, %v231_v34  ;;  %v2231_v55 = vpack.c.bf16 %v237_v53, %v233_v43  ;;  %v1971_v30 = vld [vmem:[#allocation4 + $0x320] ss:$16 sps:$4 sm:$0xff]   ;;  %v1974_v31 = vld [vmem:[#allocation4 + $0x328] ss:$16 sps:$4 sm:$0xff]   ;;  %v1979_v32 = vld [vmem:[#allocation4 + $0x344] ss:$16 sps:$4 sm:$0xff]  }
 0x11b   :  { %v240_v46 = vpack.c.bf16 %v236_v39, %v232_v38  ;;  %v242_v58 = vpack.c.bf16 %v238_v54, %v234_v49  ;;  %v1977_v34 = vld [vmem:[#allocation4 + $0x340] ss:$16 sps:$4 sm:$0xff]   ;;  %v1980_v35 = vld [vmem:[#allocation4 + $0x348] ss:$16 sps:$4 sm:$0xff]   ;;  %v1985_v36 = vld [vmem:[#allocation4 + $0x364] ss:$16 sps:$4 sm:$0xff]  }
 0x11c   :  { %v1988_v37 = vld [vmem:[#allocation4 + $0x36c] ss:$16 sps:$4 sm:$0xff]   ;;  %v1983_v38 = vld [vmem:[#allocation4 + $0x360] ss:$16 sps:$4 sm:$0xff]   ;;  %v1986_v39 = vld [vmem:[#allocation4 + $0x368] ss:$16 sps:$4 sm:$0xff]  }
 0x11d   :  { %1065 = vmatprep.mubr.bf16.mxu0 %v240_v46  ;;  %1151 = vmatprep.mubr.bf16.mxu1 %v240_v46  ;;  %v1991_v40 = vld [vmem:[#allocation4 + $0x384] ss:$16 sps:$4 sm:$0xff]   ;;  %v1994_v41 = vld [vmem:[#allocation4 + $0x38c] ss:$16 sps:$4 sm:$0xff]   ;;  %v1992_v43 = vld [vmem:[#allocation4 + $0x388] ss:$16 sps:$4 sm:$0xff]  }
 0x11e   :  { %1066 = vmatmul.mubr.bf16.vlgmr.msra.gmra.mrb[4].mxu0 %v239_v42  ;;  %1152 = vmatmul.mubr.bf16.vlgmr.msra.gmra.mrb[4].mxu1 %v239_v42  ;;  %v1989_v42 = vld [vmem:[#allocation4 + $0x380] ss:$16 sps:$4 sm:$0xff]   ;;  %v1997_v44 = vld [vmem:[#allocation4 + $0x3a4] ss:$16 sps:$4 sm:$0xff]   ;;  %v2000_v45 = vld [vmem:[#allocation4 + $0x3ac] ss:$16 sps:$4 sm:$0xff]  }
 0x11f   :  { %1077 = vmatpush1.bf16.msra.mxu0 %v1917_v47  ;;  %1163 = vmatpush1.bf16.msra.mxu1 %v1920_v48  ;;  %v1995_v46 = vld [vmem:[#allocation4 + $0x3a0] ss:$16 sps:$4 sm:$0xff]   ;;  %v1998_v47 = vld [vmem:[#allocation4 + $0x3a8] ss:$16 sps:$4 sm:$0xff]   ;;  %v2003_v48 = vld [vmem:[#allocation4 + $0x3c4] ss:$16 sps:$4 sm:$0xff]  }
 0x120   :  { %1078 = vmatprep.subr.bf16.mxu0 %v1925_v51  ;;  %1164 = vmatprep.subr.bf16.mxu1 %v1928_v52  ;;  %v2006_v49 = vld [vmem:[#allocation4 + $0x3cc] ss:$16 sps:$4 sm:$0xff]   ;;  %v2001_v50 = vld [vmem:[#allocation4 + $0x3c0] ss:$16 sps:$4 sm:$0xff]   ;;  %v2004_v51 = vld [vmem:[#allocation4 + $0x3c8] ss:$16 sps:$4 sm:$0xff]  }
 0x121   :  { %1108 = vmatprep.mubr.bf16.mxu0 %v242_v58  ;;  %1194 = vmatprep.mubr.bf16.mxu1 %v242_v58  ;;  %v2009_v52 = vld [vmem:[#allocation4 + $0x3e4] ss:$16 sps:$4 sm:$0xff]   ;;  %v2012_v53 = vld [vmem:[#allocation4 + $0x3ec] ss:$16 sps:$4 sm:$0xff]   ;;  %v2007_v54 = vld [vmem:[#allocation4 + $0x3e0] ss:$16 sps:$4 sm:$0xff]  }
 0x122   :  { %v2014_v58 = vld [vmem:[#allocation6 + $0xc0] sm:$0xff]  }
 0x123   :  { %1079 = vmatpush1.bf16.msra.mxu0 %v1923_v56  ;;  %1165 = vmatpush1.bf16.msra.mxu1 %v1926_v57  ;;  %v2010_v56 = vld [vmem:[#allocation4 + $0x3e8] ss:$16 sps:$4 sm:$0xff]   ;;  %v2013_v57 = vld [vmem:[#allocation6 + $0x40] sm:$0xff]  }
 0x124   :  { %1080 = vmatprep.subr.bf16.mxu0 %v1931_v59  ;;  %1166 = vmatprep.subr.bf16.mxu1 %v1934_v60  ;;  %v2015_v59 = vld [vmem:[#allocation6] sm:$0xff]  }
 0x125   :  { %v2016_v60 = vld [vmem:[#allocation6 + $0x80] sm:$0xff]  }
 0x127   :  { %1081 = vmatpush1.bf16.msra.mxu0 %v1929_v61  ;;  %1167 = vmatpush1.bf16.msra.mxu1 %v1932_v62  ;;  %v2017_v61 = vld [vmem:[#allocation6 + $0x48] sm:$0xff]  }
 0x128   :  { %1082 = vmatprep.subr.bf16.mxu0 %v1937_v63  ;;  %1168 = vmatprep.subr.bf16.mxu1 %v1940_v0  ;;  %v2018_v62 = vld [vmem:[#allocation6 + $0xc8] sm:$0xff]  }
 0x129   :  { %v2019_v63 = vld [vmem:[#allocation6 + $0x8] sm:$0xff]  }
 0x12a   :  { %v2020_v0 = vld [vmem:[#allocation6 + $0x88] sm:$0xff]  }
 0x12b   :  { %1083 = vmatpush1.bf16.msra.mxu0 %v1935_v1  ;;  %1169 = vmatpush1.bf16.msra.mxu1 %v1938_v2  ;;  %v2021_v1 = vld [vmem:[#allocation6 + $0x50] sm:$0xff]  }
 0x12c   :  { %1084 = vmatprep.subr.bf16.mxu0 %v1943_v3  ;;  %1170 = vmatprep.subr.bf16.mxu1 %v1946_v4  ;;  %v2022_v2 = vld [vmem:[#allocation6 + $0xd0] sm:$0xff]  }
 0x12d   :  { %v2023_v3 = vld [vmem:[#allocation6 + $0x10] sm:$0xff]  }
 0x12e   :  { %v2024_v4 = vld [vmem:[#allocation6 + $0x90] sm:$0xff]  }
 0x12f   :  { %1085 = vmatpush1.bf16.msra.mxu0 %v1941_v5  ;;  %1171 = vmatpush1.bf16.msra.mxu1 %v1944_v6  ;;  %v2025_v5 = vld [vmem:[#allocation6 + $0x58] sm:$0xff]  }
 0x130   :  { %1086 = vmatprep.subr.bf16.mxu0 %v1949_v7  ;;  %1172 = vmatprep.subr.bf16.mxu1 %v1952_v8  ;;  %v2026_v6 = vld [vmem:[#allocation6 + $0xd8] sm:$0xff]   ;;  %v2029_v8 = vld [vmem:[#allocation6 + $0x60] sm:$0xff]  }
 0x131   :  { %v2027_v7 = vld [vmem:[#allocation6 + $0x18] sm:$0xff]  }
 0x133   :  { %1087 = vmatpush1.bf16.msra.mxu0 %v1947_v9  ;;  %1173 = vmatpush1.bf16.msra.mxu1 %v1950_v10  ;;  %v2030_v9 = vld [vmem:[#allocation6 + $0xe0] sm:$0xff]  }
 0x134   :  { %1088 = vmatprep.subr.bf16.mxu0 %v1955_v11  ;;  %1174 = vmatprep.subr.bf16.mxu1 %v1958_v12  ;;  %v2031_v10 = vld [vmem:[#allocation6 + $0x20] sm:$0xff]   ;;  %v2033_v12 = vld [vmem:[#allocation6 + $0x68] sm:$0xff]  }
 0x135   :  { %v2032_v11 = vld [vmem:[#allocation6 + $0xa0] sm:$0xff]  }
 0x137   :  { %1089 = vmatpush1.bf16.msra.mxu0 %v1953_v13  ;;  %1175 = vmatpush1.bf16.msra.mxu1 %v1956_v14  ;;  %v2034_v13 = vld [vmem:[#allocation6 + $0xe8] sm:$0xff]  }
 0x138   :  { %1090 = vmatprep.subr.bf16.mxu0 %v1961_v17  ;;  %1176 = vmatprep.subr.bf16.mxu1 %v1964_v19  ;;  %v2035_v14 = vld [vmem:[#allocation6 + $0x28] sm:$0xff]   ;;  %v2037_v19 = vld [vmem:[#allocation6 + $0x70] sm:$0xff]  }
 0x139   :  { %v2036_v17 = vld [vmem:[#allocation6 + $0xa8] sm:$0xff]  }
 0x13b   :  { %1091 = vmatpush1.bf16.msra.mxu0 %v1959_v21  ;;  %1177 = vmatpush1.bf16.msra.mxu1 %v1962_v23  ;;  %v2038_v21 = vld [vmem:[#allocation6 + $0xf0] sm:$0xff]  }
 0x13c   :  { %1092 = vmatprep.subr.bf16.mxu0 %v1967_v24  ;;  %1178 = vmatprep.subr.bf16.mxu1 %v1970_v25  ;;  %v2039_v23 = vld [vmem:[#allocation6 + $0x30] sm:$0xff]   ;;  %v2041_v25 = vld [vmem:[#allocation6 + $0x78] sm:$0xff]  }
 0x13d   :  { %v2040_v24 = vld [vmem:[#allocation6 + $0xb0] sm:$0xff]  }
 0x13f   :  { %1093 = vmatpush1.bf16.msra.mxu0 %v1965_v26  ;;  %1179 = vmatpush1.bf16.msra.mxu1 %v1968_v27  ;;  %v2042_v26 = vld [vmem:[#allocation6 + $0xf8] sm:$0xff]  }
 0x140   :  { %1094 = vmatprep.subr.bf16.mxu0 %v1973_v28  ;;  %1180 = vmatprep.subr.bf16.mxu1 %v1976_v29  ;;  %v2043_v27 = vld [vmem:[#allocation6 + $0x38] sm:$0xff]   ;;  %v371_v29 = vld [vmem:[%s2259_s4] sm:$0xf] }
 0x141   :  { %v2044_v28 = vld [vmem:[#allocation6 + $0xb8] sm:$0xff]  }
 0x143   :  { %1095 = vmatpush1.bf16.msra.mxu0 %v1971_v30  ;;  %1181 = vmatpush1.bf16.msra.mxu1 %v1974_v31  ;;  %v376_v30 = vrot.slane %v371_v29, %v83_v16  ;;  %v384_v31 = vrot.slane %v371_v29, %v91_v20 }
 0x144   :  { %1096 = vmatprep.subr.bf16.mxu0 %v1979_v32  ;;  %1182 = vmatprep.subr.bf16.mxu1 %v1982_v33  ;;  %v380_v32 = vrot.slane %v371_v29, %v87_v18  ;;  %v388_v33 = vrot.slane %v371_v29, %v95_v22 }
 0x147   :  { %1097 = vmatpush1.bf16.msra.mxu0 %v1977_v34  ;;  %1183 = vmatpush1.bf16.msra.mxu1 %v1980_v35 }
 0x148   :  { %1098 = vmatprep.subr.bf16.mxu0 %v1985_v36  ;;  %1184 = vmatprep.subr.bf16.mxu1 %v1988_v37 }
 0x14b   :  { %1099 = vmatpush1.bf16.msra.mxu0 %v1983_v38  ;;  %1185 = vmatpush1.bf16.msra.mxu1 %v1986_v39 }
 0x14c   :  { %1100 = vmatprep.subr.bf16.mxu0 %v1991_v40  ;;  %1186 = vmatprep.subr.bf16.mxu1 %v1994_v41 }
 0x14f   :  { %1101 = vmatpush1.bf16.msra.mxu0 %v1989_v42  ;;  %1187 = vmatpush1.bf16.msra.mxu1 %v1992_v43 }
 0x150   :  { %1102 = vmatprep.subr.bf16.mxu0 %v1997_v44  ;;  %1188 = vmatprep.subr.bf16.mxu1 %v2000_v45 }
 0x153   :  { %1103 = vmatpush1.bf16.msra.mxu0 %v1995_v46  ;;  %1189 = vmatpush1.bf16.msra.mxu1 %v1998_v47 }
 0x154   :  { %1104 = vmatprep.subr.bf16.mxu0 %v2003_v48  ;;  %1190 = vmatprep.subr.bf16.mxu1 %v2006_v49 }
 0x157   :  { %1105 = vmatpush1.bf16.msra.mxu0 %v2001_v50  ;;  %1191 = vmatpush1.bf16.msra.mxu1 %v2004_v51 }
 0x158   :  { %1106 = vmatprep.subr.bf16.mxu0 %v2009_v52  ;;  %1192 = vmatprep.subr.bf16.mxu1 %v2012_v53 }
 0x15b   :  { %1107 = vmatpush1.bf16.msra.mxu0 %v2007_v54  ;;  %1193 = vmatpush1.bf16.msra.mxu1 %v2010_v56 }
 0x15c   :  { %1741 = vmatprep.subr.bf16.mxu0 %v2013_v57  ;;  %1763 = vmatprep.subr.bf16.mxu1 %v2014_v58 }
 0x15e   :  { %1109 = vmatmul.mubr.bf16.vlgmr.msra.gmra.mrb[4].mxu0 %v2231_v55  ;;  %1195 = vmatmul.mubr.bf16.vlgmr.msra.gmra.mrb[4].mxu1 %v2231_v55  ;;  %v2028_v55 = vld [vmem:[#allocation6 + $0x98] sm:$0xff]  }
 0x15f   :  { %1742 = vmatpush3.bf16.msra.mxu0 %v2015_v59  ;;  %1764 = vmatpush3.bf16.msra.mxu1 %v2016_v60  ;;  %v1708_v60 = vld [vmem:[%s2261_s6] ss:$0 sm:$0xff] }
 0x160   :  { %1743 = vmatprep.subr.bf16.mxu0 %v2017_v61  ;;  %1765 = vmatprep.subr.bf16.mxu1 %v2018_v62 }
 0x163   :  { %1744 = vmatpush3.bf16.msra.mxu0 %v2019_v63  ;;  %1766 = vmatpush3.bf16.msra.mxu1 %v2020_v0 }
 0x164   :  { %1745 = vmatprep.subr.bf16.mxu0 %v2021_v1  ;;  %1767 = vmatprep.subr.bf16.mxu1 %v2022_v2 }
 0x167   :  { %1746 = vmatpush3.bf16.msra.mxu0 %v2023_v3  ;;  %1768 = vmatpush3.bf16.msra.mxu1 %v2024_v4 }
 0x168   :  { %1747 = vmatprep.subr.bf16.mxu0 %v2025_v5  ;;  %1769 = vmatprep.subr.bf16.mxu1 %v2026_v6 }
 0x16b   :  { %1748 = vmatpush3.bf16.msra.mxu0 %v2027_v7  ;;  %1770 = vmatpush3.bf16.msra.mxu1 %v2028_v55 }
 0x16c   :  { %1749 = vmatprep.subr.bf16.mxu0 %v2029_v8  ;;  %1771 = vmatprep.subr.bf16.mxu1 %v2030_v9 }
 0x16f   :  { %1750 = vmatpush3.bf16.msra.mxu0 %v2031_v10  ;;  %1772 = vmatpush3.bf16.msra.mxu1 %v2032_v11 }
 0x170   :  { %1751 = vmatprep.subr.bf16.mxu0 %v2033_v12  ;;  %1773 = vmatprep.subr.bf16.mxu1 %v2034_v13 }
 0x173   :  { %1752 = vmatpush3.bf16.msra.mxu0 %v2035_v14  ;;  %1774 = vmatpush3.bf16.msra.mxu1 %v2036_v17 }
 0x174   :  { %1753 = vmatprep.subr.bf16.mxu0 %v2037_v19  ;;  %1775 = vmatprep.subr.bf16.mxu1 %v2038_v21 }
 0x177   :  { %1754 = vmatpush3.bf16.msra.mxu0 %v2039_v23  ;;  %1776 = vmatpush3.bf16.msra.mxu1 %v2040_v24 }
 0x178   :  { %1755 = vmatprep.subr.bf16.mxu0 %v2041_v25  ;;  %1777 = vmatprep.subr.bf16.mxu1 %v2042_v26 }
 0x17b   :  { %1756 = vmatpush3.bf16.msra.mxu0 %v2043_v27  ;;  %1778 = vmatpush3.bf16.msra.mxu1 %v2044_v28 }
 0x231   :  { %v1110_v34 = vpop.f32.mrb[4].mxu0  ;;  %v1196_v35 = vpop.f32.mrb[4].mxu1 }
 0x232   :  { %v1785_v36 = vadd.f32 %v1110_v34, %v376_v30  ;;  %v1789_v37 = vadd.f32 %v1196_v35, %v384_v31  ;;  %v1112_v38 = vpop.f32.mrb[5].mxu0  ;;  %v1198_v39 = vpop.f32.mrb[5].mxu1 }
 0x233   :  { %v1786_v40 = vadd.f32 %v1112_v38, %v380_v32  ;;  %v1790_v41 = vadd.f32 %v1198_v39, %v388_v33  ;;  %v1114_v42 = vpop.f32.mrb[6].mxu0  ;;  %v1200_v43 = vpop.f32.mrb[6].mxu1 }
 0x234   :  { %v1787_v16 = vadd.f32 %v1114_v42, %v376_v30  ;;  %v1791_v44 = vadd.f32 %v1200_v43, %v384_v31  ;;  %v1116_v45 = vpop.f32.mrb[7].mxu0  ;;  %v1202_v20 = vpop.f32.mrb[7].mxu1  ;;  %v1205_v18 = vmax.f32 %v1785_v36, 0.0  ;;  %v1207_v48 = vmax.f32 %v1789_v37, 0.0 }
 0x235   :  { %v1788_v46 = vadd.f32 %v1116_v45, %v380_v32  ;;  %v1792_v47 = vadd.f32 %v1202_v20, %v388_v33  ;;  %v1206_v49 = vmax.f32 %v1786_v40, 0.0  ;;  %v1208_v50 = vmax.f32 %v1790_v41, 0.0 }
 0x236   :  { %v1209_v15 = vmax.f32 %v1787_v16, 0.0  ;;  %v1211_v22 = vmax.f32 %v1791_v44, 0.0 }
 0x237   :  { %v1210_v51 = vmax.f32 %v1788_v46, 0.0  ;;  %v1212_v52 = vmax.f32 %v1792_v47, 0.0 }
 0x238   :  { %v1213_v53 = vpack.c.bf16 %v1209_v15, %v1205_v18  ;;  %v1215_v54 = vpack.c.bf16 %v1211_v22, %v1207_v48 }
 0x239   :  { %v1214_v56 = vpack.c.bf16 %v1210_v51, %v1206_v49  ;;  %v1216_v57 = vpack.c.bf16 %v1212_v52, %v1208_v50 }
 0x23b   :  { %1512 = vmatprep.mubr.bf16.mxu0 %v1214_v56  ;;  %1553 = vmatprep.mubr.bf16.mxu1 %v1216_v57 }
 0x23c   :  { %1513 = vmatmul.mubr.bf16.vlgmr.msra.gmra.mrb[8].mxu0 %v1213_v53  ;;  %1554 = vmatmul.mubr.bf16.vlgmr.msra.gmra.mrb[8].mxu1 %v1215_v54 }
 0x30f   :  { %v1757_v58 = vpop.f32.mrb[8].mxu0  ;;  %v1779_v59 = vpop.f32.mrb[8].mxu1 }
 0x310   :  { %v1758_v61 = vpop.f32.mrb[9].mxu0  ;;  %v1780_v62 = vpop.f32.mrb[9].mxu1 }
 0x311   :  { %v1759_v63 = vadd.f32 %v1758_v61, %v1757_v58  ;;  %v1781_v0 = vadd.f32 %v1780_v62, %v1779_v59  ;;  %v1760_v1 = vpop.f32.mrb[10].mxu0  ;;  %v1782_v2 = vpop.f32.mrb[10].mxu1 }
 0x312   :  { %v1761_v3 = vpop.f32.mrb[11].mxu0  ;;  %v1783_v4 = vpop.f32.mrb[11].mxu1 }
 0x313   :  { %v1515_v5 = vadd.f32 %v1759_v63, %v1708_v60  ;;  %v1762_v6 = vadd.f32 %v1761_v3, %v1760_v1  ;;  %v1784_v7 = vadd.f32 %v1783_v4, %v1782_v2 }
 0x315   :  { %v1556_v55 = vadd.f32 %v1781_v0, %v1515_v5  ;;  %v1518_v8 = vadd.f32 %v1762_v6, %v1708_v60 }
 0x317   :  { %1562 = vst [vmem:[%s2262_s7] sm:$0xff] %v1556_v55  ;;  %v1559_v9 = vadd.f32 %v1784_v7, %v1518_v8 }
 0x319   :  { %1563 = vst [vmem:[%s2262_s7 + $0x8] sm:$0xff] %v1559_v9 }
 0x31a   :  { %1568 = vsyncpa [#allocation3], 1 }
 0x31b   :  { %1569 = vsyncpa [#allocation5], 1 }

</bundles_post_ra>
